<compile_context>
chip_gen: v6e
topology: v6e:2x2x1
jax: 0.10.0
libtpu: 0.0.40
codegen_flags: <defaults>
</compile_context>

<pallas_src>
import functools

import jax
import jax.numpy as jnp
import numpy as np
from jax.experimental import pallas as pl
from jax.experimental.pallas import tpu as pltpu


# ------------------------------- kernel ------------------------------------
def _sine_kernel(x_ref, o_ref, *, scale):
    # x_ref / o_ref: (tm, LANE_W) lane-dense tiles.
    x = x_ref[...].astype(jnp.float32)
    o_ref[...] = jnp.sin(scale * x).astype(o_ref.dtype)


# ------------------------------- wrapper ------------------------------------
def sine_pallas(x, *, scale=30.0, lane_width=1024, tm_target=512):
    """Elementwise sin(scale * x) for an array of any shape/leading dims."""
    orig_shape = x.shape
    orig_dtype = x.dtype
    n = int(np.prod(orig_shape)) if orig_shape else 1
    flat = x.reshape(-1)

    # Lane-dense slab: width is a big multiple of 128 -> unmasked vector stores.
    w = lane_width
    rows = pl.cdiv(n, w)

    # Tall row tile, multiple of 8; keep >=2 grid steps when there is enough
    # work so both v7x TensorCores can be fed via the "parallel" grid axis.
    tm = min(tm_target, rows)
    if rows >= 16:
        tm = min(tm, pl.cdiv(rows, 2))
    tm = max(8, ((tm + 7) // 8) * 8)

    rows_pad = pl.cdiv(rows, tm) * tm
    total_pad = rows_pad * w
    if total_pad != n:
        flat = jnp.pad(flat, (0, total_pad - n))
    x2 = flat.reshape(rows_pad, w)

    grid = (rows_pad // tm,)
    kernel = functools.partial(_sine_kernel, scale=scale)

    out = pl.pallas_call(
        kernel,
        out_shape=jax.ShapeDtypeStruct((rows_pad, w), orig_dtype),
        grid=grid,
        in_specs=[pl.BlockSpec((tm, w), lambda i: (i, 0))],
        out_specs=pl.BlockSpec((tm, w), lambda i: (i, 0)),
        compiler_params=pltpu.CompilerParams(
            dimension_semantics=("parallel",)),
    )(x2)

    return out.reshape(-1)[:n].reshape(orig_shape)


# ------------------------------ reference -----------------------------------
def sine_ref(x, *, scale=30.0):
    return jnp.sin(scale * x.astype(jnp.float32)).astype(x.dtype)


# -------------------------------- main ---------------------------------------
if __name__ == "__main__":
    key = jax.random.PRNGKey(0)
    # Small input consistent with an implicit-network feature map: (B, C, H, W).
    x = jax.random.normal(key, (2, 4, 16, 16), jnp.float32)

    out = sine_pallas(x)
    out = jax.block_until_ready(out)

    ref = sine_ref(x)
    np.testing.assert_allclose(np.asarray(out), np.asarray(ref),
                               rtol=1e-5, atol=1e-5)

    print("KERNEL_OK")
</pallas_src>

<mosaic_0001>
module attributes {stable_mosaic.version = 11 : i64} {
  func.func @_sine_kernel(%arg0: i32, %arg1: memref<8x1024xf32, #tpu.memory_space<vmem>>, %arg2: memref<8x1024xf32, #tpu.memory_space<vmem>>) attributes {dimension_semantics = [#tpu.dimension_semantics<parallel>], iteration_bounds = array<i64: 1>, scalar_prefetch = 0 : i64, scratch_operands = 0 : i64, tpu.core_type = #tpu.core_type<tc>, window_params = [{transform_indices = @transform_0, window_bounds = array<i64: 8, 1024>}, {transform_indices = @transform_1, window_bounds = array<i64: 8, 1024>}]} {
    %c0 = arith.constant 0 : index
    %c0_0 = arith.constant 0 : index
    %0 = vector.load %arg1[%c0, %c0_0] : memref<8x1024xf32, #tpu.memory_space<vmem>>, vector<8x1024xf32>
    %cst = arith.constant 3.000000e+01 : f32
    %1 = vector.broadcast %cst : f32 to vector<8x1024xf32>
    %2 = arith.mulf %1, %0 : vector<8x1024xf32>
    %3 = math.sin %2 : vector<8x1024xf32>
    %c0_1 = arith.constant 0 : index
    %c0_2 = arith.constant 0 : index
    %4 = vector.load %arg2[%c0_1, %c0_2] : memref<8x1024xf32, #tpu.memory_space<vmem>>, vector<8x1024xf32>
    tpu.vector_store %arg2[%c0_1, %c0_2], %3 {strides = array<i32>} : memref<8x1024xf32, #tpu.memory_space<vmem>>, vector<8x1024xf32>,
    return
  }
  func.func @transform_0(%arg0: i32) -> (i32, i32) {
    %c0_i32 = arith.constant 0 : i32
    %c0_i32_0 = arith.constant 0 : i32
    return %arg0, %c0_i32 : i32, i32
  }
  func.func @transform_1(%arg0: i32) -> (i32, i32) {
    %c0_i32 = arith.constant 0 : i32
    %c0_i32_0 = arith.constant 0 : i32
    return %arg0, %c0_i32 : i32, i32
  }
}

</mosaic_0001>

<bundles_post_ra>
// kernel: tpu_custom_call.1
= control target key start
LH: loop header
LB: loop body
LE: loop exit
PB: predicated region body
PF: predicated region fallthrough
CT: control target
= control target key end

     0   :  { %6 = vsyncpa [#allocation3], 0  ;;  %s1647_s0 = inlined_call_operand.hbm [shape: f32[8,1024], index: 0, kind: input, shape index: {}]   ;;  %s1648_s1 = inlined_call_operand.hbm [shape: f32[8,1024], index: 1, kind: output, shape index: {}]  }
   0x1   :  { %7 = vsyncpa [#allocation4], 0  ;;  %s1040_s6 = smov [#allocation2]  }
   0x2   :  { %s14_s7 = sshll.u32 %s1040_s6, 4  ;;  %s15_s7 = int_to_ptr.vmem [resolvable:$true] %s14_s7 }
   0x3   :  { %s1004_s8 = scalar_lea.vmem %s15_s7, 1024  ;;  %p1009_p1 = scmp.lt.s32.totalorder %s15_s7, %s15_s7 }
   0x4   :  { %p1005_p0 = scmp.ne.s32.totalorder %s15_s7, %s1004_s8  ;;  %p1010_p2 = scmp.lt.s32.totalorder %s1004_s8, %s1004_s8 }
   0x6   :  { %p1011_p3 = por %p1010_p2, %p1009_p1 }
   0x8   :  { %p1012_p4 = pnand %p1011_p3, %p1005_p0 }
   0xa   :  { %1015 = shalt.err (!%p1012_p4)
}
   0xb   :  { %17 = dma.hbm_to_vmem [thread:$0]  %s1647_s0, 1024, %s15_s7, [#allocation3]  }
   0xc   :  { %1036 = dma.done.wait [#allocation3], 1024  }
   0xd   :  { %1037 = vsyncadd [#allocation3], 4294966272  ;;  %v21_v0 = vld [vmem:[#allocation2] sm:$0xff]  ;;  %v22_v1 = vld [vmem:[#allocation2 + $0x8] sm:$0xff]  ;;  %v1041_v36 = vmov 683565275  }
   0xe   :  { %v23_v2 = vld [vmem:[#allocation2 + $0x10] sm:$0xff]  ;;  %v1061_v3 = vmul.f32 30.0, %v21_v0  ;;  %v1063_v4 = vmul.f32 30.0, %v22_v1  ;;  %v24_v18 = vld [vmem:[#allocation2 + $0x18] sm:$0xff]  ;;  %v1042_v38 = vmov 2475754826  }
   0xf   :  { %v1065_v5 = vmul.f32 30.0, %v23_v2  ;;  %v1077_v25 = vmul.f32 30.0, %v24_v18  ;;  %v1043_v40 = vmov 2131351028   ;;  %v1044_v42 = vmov 2102212464  }
  0x10   :  { %v37_v6 = vand.u32 2147483647, %v1061_v3  ;;  %v40_v7 = vand.u32 2139095040, %v1061_v3  ;;  %v141_v8 = vand.u32 2147483647, %v1063_v4  ;;  %v144_v9 = vand.u32 2139095040, %v1063_v4 }
  0x11   :  { %v248_v14 = vand.u32 2139095040, %v1065_v5  ;;  %v245_v23 = vand.u32 2147483647, %v1065_v5  ;;  %v1045_v44 = vmov 920167782   ;;  %vm39_vm12 = vcmp.lt.s32.totalorder %v1061_v3, 0 }
  0x12   :  { %v41_v10 = vshrl.u32 %v40_v7, 23  ;;  %v44_v11 = vand.u32 8388607, %v37_v6  ;;  %v145_v12 = vshrl.u32 %v144_v9, 23  ;;  %v148_v13 = vand.u32 8388607, %v141_v8 }
  0x13   :  { %v249_v17 = vshrl.u32 %v248_v14, 23  ;;  %v1085_v33 = vand.u32 8388607, %v245_v23  ;;  %v1046_v52 = vmov 1326507024   ;;  %s1047_s0 = smov [#allocation5]  }
  0x14   :  { %v892_v15 = vadd.s32 4294967169, %v41_v10  ;;  %v896_v16 = vadd.s32 4294967169, %v145_v12  ;;  %v45_v19 = vor.u32 8388608, %v44_v11  ;;  %v149_v21 = vor.u32 8388608, %v148_v13  ;;  %s883_s11 = sshll.u32 %s1047_s0, 4  ;;  %s884_s11 = int_to_ptr.vmem [resolvable:$true] %s883_s11 }
  0x15   :  { %v900_v24 = vadd.s32 4294967169, %v249_v17  ;;  %vm1170_vm14 = vcmp.le.f32.partialorder %v37_v6, 0.7853982  ;;  %s1016_s12 = scalar_lea.vmem %s884_s11, 1024  ;;  %p1021_p6 = scmp.lt.s32.totalorder %s884_s11, %s884_s11 }
  0x16   :  { %v47_v20 = vadd.s32 1, %v892_v15  ;;  %v151_v22 = vadd.s32 1, %v896_v16  ;;  %v1079_v29 = vshll.u32 %v45_v19, 8  ;;  %v1081_v32 = vshll.u32 %v149_v21, 8  ;;  %p1017_p5 = scmp.ne.s32.totalorder %s884_s11, %s1016_s12  ;;  %p1022_p7 = scmp.lt.s32.totalorder %s1016_s12, %s1016_s12 }
  0x17   :  { %v1087_v34 = vadd.s32 1, %v900_v24 }
  0x18   :  { %vm48_vm0 = vcmp.gt.s32.totalorder %v47_v20, 0  ;;  %vm152_vm1 = vcmp.gt.s32.totalorder %v151_v22, 0  ;;  %p1023_p8 = por %p1022_p7, %p1021_p6 }
  0x19   :  { %v49_v26 = vsel %vm48_vm0, %v47_v20, 0  ;;  %v153_v30 = vsel %vm152_vm1, %v151_v22, 0  ;;  %vm256_vm6 = vcmp.gt.s32.totalorder %v1087_v34, 0 }
  0x1a   :  { %v50_v27 = vshrl.u32 %v49_v26, 5  ;;  %v51_v28 = vand.u32 31, %v49_v26  ;;  %v155_v31 = vand.u32 31, %v153_v30  ;;  %v1094_v46 = vshrl.u32 %v153_v30, 5  ;;  %p1024_p9 = pnand %p1023_p8, %p1017_p5 }
  0x1c   :  { %v52_v35 = vsub.s32 32, %v51_v28  ;;  %v54_v37 = vshll.u32 %v1041_v36, %v51_v28  ;;  %v57_v39 = vshll.u32 %v1042_v38, %v51_v28  ;;  %v60_v41 = vshll.u32 %v1043_v40, %v51_v28 }
  0x1d   :  { %v63_v43 = vshll.u32 %v1044_v42, %v51_v28  ;;  %v66_v45 = vshll.u32 %v1045_v44, %v51_v28  ;;  %vm69_vm2 = vcmp.lt.s32.totalorder %v50_v27, 1  ;;  %vm70_vm3 = vcmp.lt.s32.totalorder %v50_v27, 2 }
  0x1e   :  { %v53_v47 = vshrl.u32 %v1041_v36, %v52_v35  ;;  %v55_v48 = vshrl.u32 %v1042_v38, %v52_v35  ;;  %v58_v49 = vshrl.u32 %v1043_v40, %v52_v35  ;;  %v61_v50 = vshrl.u32 %v1044_v42, %v52_v35 }
  0x1f   :  { %v64_v51 = vshrl.u32 %v1045_v44, %v52_v35  ;;  %v67_v53 = vshrl.u32 %v1046_v52, %v52_v35  ;;  %vm72_vm4 = vcmp.lt.s32.totalorder %v50_v27, 4  ;;  %v156_v57 = vsub.s32 32, %v155_v31 }
  0x20   :  { %v56_v54 = vor.u32 %v55_v48, %v54_v37  ;;  %v59_v55 = vor.u32 %v58_v49, %v57_v39  ;;  %v62_v56 = vor.u32 %v61_v50, %v60_v41  ;;  %vm71_vm5 = vcmp.lt.s32.totalorder %v50_v27, 3 }
  0x21   :  { %v65_v58 = vor.u32 %v64_v51, %v63_v43  ;;  %v68_v59 = vor.u32 %v67_v53, %v66_v45  ;;  %v158_v60 = vshll.u32 %v1041_v36, %v155_v31  ;;  %v161_v9 = vshll.u32 %v1042_v38, %v155_v31 }
  0x22   :  { %v73_v61 = vsel %vm69_vm2, %v53_v47, %v56_v54  ;;  %v74_v62 = vsel %vm72_vm4, %v62_v56, 2102212464  ;;  %v77_v63 = vsel %vm69_vm2, %v56_v54, %v59_v55  ;;  %v81_v0 = vsel %vm69_vm2, %v59_v55, %v62_v56 }
  0x23   :  { %v75_v1 = vsel %vm71_vm5, %v59_v55, %v74_v62  ;;  %v78_v2 = vsel %vm72_vm4, %v65_v58, 920167782  ;;  %v82_v7 = vsel %vm72_vm4, %v68_v59, 1326507024  ;;  %v157_v12 = vshrl.u32 %v1041_v36, %v156_v57 }
  0x24   :  { %v79_v10 = vsel %vm71_vm5, %v62_v56, %v78_v2  ;;  %v83_v11 = vsel %vm71_vm5, %v65_v58, %v82_v7  ;;  %v159_v13 = vshrl.u32 %v1042_v38, %v156_v57  ;;  %v76_v14 = vsel %vm70_vm3, %v73_v61, %v75_v1  ;;  %v25_v61 = vld [vmem:[#allocation2 + $0x20] sm:$0xff] }
  0x25   :  { %v80_v15 = vsel %vm70_vm3, %v77_v63, %v79_v10  ;;  %v84_v16 = vsel %vm70_vm3, %v81_v0, %v83_v11  ;;  %v162_v17 = vshrl.u32 %v1043_v40, %v156_v57  ;;  %v164_v26 = vshll.u32 %v1043_v40, %v155_v31 }
  0x26   :  { %v1115_v18 = vmul.u32.u64.low %v1079_v29, %v84_v16  ;;  %v1116_v19 = vmul.u32.u64.high %v1079_v29, %v84_v16, %v1115_v18  ;;  %v1119_v20 = vmul.u32.u64.low %v1079_v29, %v80_v15  ;;  %v1120_v21 = vmul.u32.u64.high %v1079_v29, %v80_v15, %v1119_v20 }
  0x27   :  { %v160_v22 = vor.u32 %v159_v13, %v158_v60  ;;  %v163_v24 = vor.u32 %v162_v17, %v161_v9  ;;  %v165_v28 = vshrl.u32 %v1044_v42, %v156_v57  ;;  %v167_v27 = vshll.u32 %v1044_v42, %v155_v31 }
  0x28   :  { %v168_v30 = vshrl.u32 %v1045_v44, %v156_v57  ;;  %v170_v35 = vshll.u32 %v1045_v44, %v155_v31  ;;  %v171_v37 = vshrl.u32 %v1046_v52, %v156_v57  ;;  %v92_v39 = vmul.u32 %v1079_v29, %v76_v14 }
  0x29   :  { %v166_v41 = vor.u32 %v165_v28, %v164_v26  ;;  %vm173_vm7 = vcmp.lt.s32.totalorder %v1094_v46, 1  ;;  %vm174_vm8 = vcmp.lt.s32.totalorder %v1094_v46, 2  ;;  %vm94_vm9 = vc.u32 %v1116_v19, %v1119_v20 }
  0x2a   :  { %v95_v43 = vadd.s32 1, %v1120_v21  ;;  %v169_v45 = vor.u32 %v168_v30, %v167_v27  ;;  %vm175_vm10 = vcmp.lt.s32.totalorder %v1094_v46, 3  ;;  %v172_v47 = vor.u32 %v171_v37, %v170_v35 }
  0x2b   :  { %vm176_vm11 = vcmp.lt.s32.totalorder %v1094_v46, 4  ;;  %v177_v31 = vsel %vm173_vm7, %v157_v12, %v160_v22  ;;  %v181_v48 = vsel %vm173_vm7, %v160_v22, %v163_v24  ;;  %v185_v51 = vsel %vm173_vm7, %v163_v24, %v166_v41 }
  0x2c   :  { %v96_v29 = vsel %vm94_vm9, %v95_v43, %v1120_v21  ;;  %v178_v49 = vsel %vm176_vm11, %v166_v41, 2102212464  ;;  %v182_v50 = vsel %vm176_vm11, %v169_v45, 920167782  ;;  %v186_v56 = vsel %vm176_vm11, %v172_v47, 1326507024 }
  0x2d   :  { %v97_v53 = vadd.s32 %v96_v29, %v92_v39  ;;  %v179_v54 = vsel %vm175_vm10, %v163_v24, %v178_v49  ;;  %v183_v55 = vsel %vm175_vm10, %v166_v41, %v182_v50  ;;  %v187_v59 = vsel %vm175_vm10, %v169_v45, %v186_v56 }
  0x2e   :  { %v180_v57 = vsel %vm174_vm8, %v177_v31, %v179_v54  ;;  %v184_v58 = vsel %vm174_vm8, %v181_v48, %v183_v55  ;;  %v257_v60 = vsel %vm256_vm6, %v1087_v34, 0  ;;  %v188_v63 = vsel %vm174_vm8, %v185_v51, %v187_v59 }
  0x2f   :  { %v98_v62 = vadd.s32 536870912, %v97_v53  ;;  %v1148_v0 = vmul.u32.u64.low %v1081_v32, %v184_v58  ;;  %v1149_v1 = vmul.u32.u64.high %v1081_v32, %v184_v58, %v1148_v0  ;;  %v253_v9 = vor.u32 8388608, %v1085_v33 }
  0x30   :  { %v1153_v2 = vmul.u32.u64.low %v1081_v32, %v188_v63  ;;  %v1154_v7 = vmul.u32.u64.high %v1081_v32, %v188_v63, %v1153_v2  ;;  %v352_v10 = vand.u32 2139095040, %v1077_v25  ;;  %v259_v34 = vand.u32 31, %v257_v60 }
  0x31   :  { %v99_v11 = vshrl.u32 %v98_v62, 30  ;;  %v1158_v12 = vmul.f32 30.0, %v25_v61  ;;  %v196_v46 = vmul.u32 %v1081_v32, %v180_v57  ;;  %v199_v14 = vadd.s32 1, %v1149_v1 }
  0x32   :  { %v260_v15 = vsub.s32 32, %v259_v34  ;;  %vm198_vm13 = vc.u32 %v1154_v7, %v1148_v0  ;;  %v1165_v16 = vshll.u32 %v253_v9, 8  ;;  %v349_v33 = vand.u32 2147483647, %v1077_v25 }
  0x33   :  { %v100_v13 = vshll.u32 %v99_v11, 30  ;;  %v353_v17 = vshrl.u32 %v352_v10, 23  ;;  %v123_v21 = vsub.s32 4, %v99_v11  ;;  %v200_v22 = vsel %vm198_vm13, %v199_v14, %v1149_v1 }
  0x34   :  { %v258_v24 = vshrl.u32 %v257_v60, 5  ;;  %v201_v26 = vadd.s32 %v200_v22, %v196_v46  ;;  %v262_v28 = vshll.u32 %v1041_v36, %v259_v34  ;;  %v263_v27 = vshrl.u32 %v1042_v38, %v260_v15 }
  0x35   :  { %v1174_v32 = vsub.s32 %v97_v53, %v100_v13  ;;  %v265_v30 = vshll.u32 %v1042_v38, %v259_v34  ;;  %v266_v6 = vshrl.u32 %v1043_v40, %v260_v15  ;;  %v268_v37 = vshll.u32 %v1043_v40, %v259_v34 }
  0x36   :  { %v269_v39 = vshrl.u32 %v1044_v42, %v260_v15  ;;  %v93_v41 = vadd.s32 %v1119_v20, %v1116_v19  ;;  %v202_v43 = vadd.s32 536870912, %v201_v26  ;;  %v271_v45 = vshll.u32 %v1044_v42, %v259_v34 }
  0x37   :  { %v103_v35 = vsub.s32 0, %v1174_v32  ;;  %v904_v47 = vadd.s32 4294967169, %v353_v17  ;;  %v124_v48 = vsel %vm39_vm12, %v123_v21, %v99_v11  ;;  %v272_v29 = vshrl.u32 %v1045_v44, %v260_v15 }
  0x38   :  { %vm280_vm15 = vcmp.lt.s32.totalorder %v258_v24, 4  ;;  %v1191_v49 = vshrl.u32 %v202_v43, 30  ;;  %v261_v50 = vshrl.u32 %v1041_v36, %v260_v15  ;;  %v274_v51 = vshll.u32 %v1045_v44, %v259_v34 }
  0x39   :  { %v893_v31 = vmin.u32 %v103_v35, %v1174_v32  ;;  %v275_v19 = vshrl.u32 %v1046_v52, %v260_v15  ;;  %v264_v53 = vor.u32 %v263_v27, %v262_v28  ;;  %v267_v54 = vor.u32 %v266_v6, %v265_v30 }
  0x3a   :  { %v270_v55 = vor.u32 %v269_v39, %v268_v37  ;;  %v204_v56 = vshll.u32 %v1191_v49, 30  ;;  %v273_v57 = vor.u32 %v272_v29, %v271_v45  ;;  %vm277_vm0 = vcmp.lt.s32.totalorder %v258_v24, 1 }
  0x3b   :  { %v105_v20 = vclz %v893_v31  ;;  %vm279_vm1 = vcmp.lt.s32.totalorder %v258_v24, 3  ;;  %v276_v59 = vor.u32 %v275_v19, %v274_v51  ;;  %v359_v61 = vadd.s32 1, %v904_v47 }
  0x3c   :  { %v282_v60 = vsel %vm280_vm15, %v270_v55, 2102212464  ;;  %v126_v62 = vsel %vm1170_vm14, 0, %v124_v48  ;;  %v1200_v63 = vsub.s32 %v201_v26, %v204_v56  ;;  %vm278_vm2 = vcmp.lt.s32.totalorder %v258_v24, 2 }
  0x3d   :  { %v894_v58 = vadd.s32 4294967294, %v105_v20  ;;  %v286_v1 = vsel %vm280_vm15, %v273_v57, 920167782  ;;  %v281_v2 = vsel %vm277_vm0, %v261_v50, %v264_v53  ;;  %v285_v9 = vsel %vm277_vm0, %v264_v53, %v267_v54 }
  0x3e   :  { %v287_v10 = vsel %vm279_vm1, %v270_v55, %v286_v1  ;;  %v207_v34 = vsub.s32 0, %v1200_v63  ;;  %v283_v46 = vsel %vm279_vm1, %v267_v54, %v282_v60  ;;  %v289_v13 = vsel %vm277_vm0, %v267_v54, %v270_v55 }
  0x3f   :  { %vm895_vm3 = vcmp.lt.s32.totalorder %v894_v58, 0  ;;  %v290_v21 = vsel %vm280_vm15, %v276_v59, 1326507024  ;;  %vm143_vm4 = vcmp.lt.s32.totalorder %v1063_v4, 0  ;;  %v288_v26 = vsel %vm278_vm2, %v285_v9, %v287_v10 }
  0x40   :  { %v108_v11 = vsel %vm895_vm3, 0, %v894_v58  ;;  %v897_v22 = vmin.u32 %v207_v34, %v1200_v63  ;;  %v291_v28 = vsel %vm279_vm1, %v273_v57, %v290_v21  ;;  %vm360_vm5 = vcmp.gt.s32.totalorder %v359_v61, 0 }
  0x41   :  { %v109_v14 = vsub.s32 32, %v108_v11  ;;  %v110_v15 = vshll.u32 %v1174_v32, %v108_v11  ;;  %v113_v17 = vsub.s32 4294967266, %v108_v11  ;;  %v292_v35 = vsel %vm278_vm2, %v289_v13, %v291_v28 }
  0x42   :  { %v130_v6 = vadd.s32 3, %v126_v62  ;;  %v209_v37 = vclz %v897_v22  ;;  %v284_v32 = vsel %vm278_vm2, %v281_v2, %v283_v46  ;;  %v1219_v39 = vand.u32 8388607, %v349_v33 }
  0x43   :  { %v111_v27 = vshrl.u32 %v93_v41, %v109_v14  ;;  %v114_v30 = vadd.s32 127, %v113_v17  ;;  %v1222_v47 = vmul.u32.u64.low %v1165_v16, %v292_v35  ;;  %v1223_v31 = vmul.u32.u64.high %v1165_v16, %v292_v35, %v1222_v47 }
  0x44   :  { %v898_v48 = vadd.s32 4294967294, %v209_v37  ;;  %v1226_v41 = vmul.u32.u64.low %v1165_v16, %v288_v26  ;;  %v1227_v29 = vmul.u32.u64.high %v1165_v16, %v288_v26, %v1226_v41  ;;  %v361_v50 = vsel %vm360_vm5, %v359_v61, 0 }
  0x45   :  { %v112_v43 = vor.u32 %v111_v27, %v110_v15  ;;  %v115_v45 = vshll.u32 %v114_v30, 23  ;;  %v227_v19 = vsub.s32 4, %v1191_v49  ;;  %v363_v20 = vand.u32 31, %v361_v50 }
  0x46   :  { %v1231_v53 = vand.u32 3, %v130_v6  ;;  %v197_v54 = vadd.s32 %v1148_v0, %v1154_v7  ;;  %vm899_vm6 = vcmp.lt.s32.totalorder %v898_v48, 0  ;;  %v357_v55 = vor.u32 8388608, %v1219_v39 }
  0x47   :  { %v116_v51 = vor.u32 4788187, %v115_v45  ;;  %v119_v24 = vcvt.s32.f32 %v112_v43  ;;  %v212_v57 = vsel %vm899_vm6, 0, %v898_v48  ;;  %v300_v58 = vmul.u32 %v1165_v16, %v284_v32 }
  0x48   :  { %vm302_vm7 = vc.u32 %v1223_v31, %v1226_v41  ;;  %vm1241_vm8 = vcmp.le.f32.partialorder %v141_v8, 0.7853982  ;;  %v213_v60 = vsub.s32 32, %v212_v57  ;;  %v214_v61 = vshll.u32 %v1200_v63, %v212_v57 }
  0x49   :  { %v117_v56 = vand.u32 2147483647, %v116_v51  ;;  %v217_v0 = vsub.s32 4294967266, %v212_v57  ;;  %v303_v7 = vadd.s32 1, %v1227_v29  ;;  %v228_v16 = vsel %vm143_vm4, %v227_v19, %v1191_v49 }
  0x4a   :  { %v1250_v1 = vshrl.u32 %v361_v50, 5  ;;  %v364_v2 = vsub.s32 32, %v363_v20  ;;  %v215_v9 = vshrl.u32 %v197_v54, %v213_v60  ;;  %v366_v11 = vshll.u32 %v1041_v36, %v363_v20 }
  0x4b   :  { %v120_v62 = vmul.f32 %v119_v24, %v117_v56  ;;  %v218_v10 = vadd.s32 127, %v217_v0  ;;  %v304_v8 = vsel %vm302_vm7, %v303_v7, %v1227_v29  ;;  %v369_v13 = vshll.u32 %v1042_v38, %v363_v20 }
  0x4c   :  { %v305_v46 = vadd.s32 %v304_v8, %v300_v58  ;;  %v367_v63 = vshrl.u32 %v1042_v38, %v364_v2  ;;  %v216_v14 = vor.u32 %v215_v9, %v214_v61  ;;  %v370_v17 = vshrl.u32 %v1043_v40, %v364_v2 }
  0x4d   :  { %v121_v34 = vxor.u32 2147483648, %v120_v62  ;;  %v219_v15 = vshll.u32 %v218_v10, 23  ;;  %v372_v49 = vshll.u32 %v1043_v40, %v363_v20  ;;  %v373_v26 = vshrl.u32 %v1044_v42, %v364_v2 }
  0x4e   :  { %v306_v22 = vadd.s32 536870912, %v305_v46  ;;  %v375_v28 = vshll.u32 %v1044_v42, %v363_v20  ;;  %v223_v35 = vcvt.s32.f32 %v216_v14  ;;  %v368_v6 = vor.u32 %v367_v63, %v366_v11 }
  0x4f   :  { %v122_v21 = vsel %vm39_vm12, %v121_v34, %v120_v62  ;;  %v220_v30 = vor.u32 4788187, %v219_v15  ;;  %v371_v32 = vor.u32 %v370_v17, %v369_v13  ;;  %v376_v39 = vshrl.u32 %v1045_v44, %v364_v2 }
  0x50   :  { %v125_v27 = vsel %vm1170_vm14, %v1061_v3, %v122_v21  ;;  %v307_v37 = vshrl.u32 %v306_v22, 30  ;;  %v378_v45 = vshll.u32 %v1045_v44, %v363_v20  ;;  %v379_v47 = vshrl.u32 %v1046_v52, %v364_v2 }
  0x51   :  { %964 = vcosq.f32 %v125_v27  ;;  %v221_v43 = vand.u32 2147483647, %v220_v30  ;;  %v230_v48 = vsel %vm1241_vm8, 0, %v228_v16  ;;  %v377_v18 = vor.u32 %v376_v39, %v375_v28 }
  0x52   :  { %966 = vsinq.f32 %v125_v27  ;;  %v308_v29 = vshll.u32 %v307_v37, 30  ;;  %vm381_vm9 = vcmp.lt.s32.totalorder %v1250_v1, 1  ;;  %v365_v51 = vshrl.u32 %v1041_v36, %v364_v2 }
  0x53   :  { %v224_v50 = vmul.f32 %v223_v35, %v221_v43  ;;  %v374_v24 = vor.u32 %v373_v26, %v372_v49  ;;  %v1272_v19 = vshll.u32 %v357_v55, 8  ;;  %vm247_vm10 = vcmp.lt.s32.totalorder %v1065_v5, 0 }
  0x54   :  { %v1275_v54 = vsub.s32 %v305_v46, %v308_v29  ;;  %v380_v20 = vor.u32 %v379_v47, %v378_v45  ;;  %vm383_vm11 = vcmp.lt.s32.totalorder %v1250_v1, 3  ;;  %vm384_vm12 = vcmp.lt.s32.totalorder %v1250_v1, 4 }
  0x55   :  { %v225_v56 = vxor.u32 2147483648, %v224_v50  ;;  %vm382_vm13 = vcmp.lt.s32.totalorder %v1250_v1, 2  ;;  %v386_v57 = vsel %vm384_vm12, %v374_v24, 2102212464  ;;  %v389_v58 = vsel %vm381_vm9, %v368_v6, %v371_v32 }
  0x56   :  { %v234_v55 = vadd.s32 3, %v230_v48  ;;  %v311_v60 = vsub.s32 0, %v1275_v54  ;;  %v331_v61 = vsub.s32 4, %v307_v37  ;;  %v390_v0 = vsel %vm384_vm12, %v377_v18, 920167782 }
  0x57   :  { %v226_v7 = vsel %vm143_vm4, %v225_v56, %v224_v50  ;;  %v385_v62 = vsel %vm381_vm9, %v365_v51, %v368_v6  ;;  %v387_v16 = vsel %vm383_vm11, %v371_v32, %v386_v57  ;;  %v391_v2 = vsel %vm383_vm11, %v374_v24, %v390_v0 }
  0x58   :  { %vm129_vm14 = vweird.f32 %v1061_v3  ;;  %v229_v9 = vsel %vm1241_vm8, %v1063_v4, %v226_v7  ;;  %v901_v10 = vmin.u32 %v311_v60, %v1275_v54  ;;  %v392_v8 = vsel %vm382_vm13, %v389_v58, %v391_v2 }
  0x59   :  { %v393_v11 = vsel %vm381_vm9, %v371_v32, %v374_v24  ;;  %968 = vcosq.f32 %v229_v9  ;;  %v394_v34 = vsel %vm384_vm12, %v380_v20, 1326507024  ;;  %vm132_vm15 = vcmp.lt.s32.totalorder %v1231_v53, 2 }
  0x5a   :  { %v1307_v46 = vmul.u32.u64.low %v1272_v19, %v392_v8  ;;  %v1308_v63 = vmul.u32.u64.high %v1272_v19, %v392_v8, %v1307_v46  ;;  %970 = vsinq.f32 %v229_v9  ;;  %vm1314_vm0 = vcmp.le.f32.partialorder %v245_v23, 0.7853982 }
  0x5b   :  { %v313_v13 = vclz %v901_v10  ;;  %vm133_vm1 = vcmp.eq.s32.totalorder %v1231_v53, 0  ;;  %vm136_vm2 = vcmp.eq.s32.totalorder %v1231_v53, 2  ;;  %v1320_v14 = vand.u32 3, %v234_v55 }
  0x5c   :  { %v395_v15 = vsel %vm383_vm11, %v377_v18, %v394_v34  ;;  %v388_v49 = vsel %vm382_vm13, %v385_v62, %v387_v16  ;;  %v456_v21 = vand.u32 2139095040, %v1158_v12  ;;  %v301_v26 = vadd.s32 %v1226_v41, %v1223_v31  ;;  %v26_v31 = vld [vmem:[#allocation2 + $0x28] sm:$0xff]  ;;  %v27_v18 = vld [vmem:[#allocation2 + $0x30] sm:$0xff] }
  0x5d   :  { %v902_v17 = vadd.s32 4294967294, %v313_v13  ;;  %v396_v23 = vsel %vm382_vm13, %v393_v11, %v395_v15  ;;  %v332_v28 = vsel %vm247_vm10, %v331_v61, %v307_v37  ;;  %v407_v32 = vadd.s32 1, %v1308_v63 }
  0x5e   :  { %v965_v22 = vpop.eup %964  ;;  %v1334_v27 = vmul.u32.u64.low %v1272_v19, %v396_v23  ;;  %v1335_v30 = vmul.u32.u64.high %v1272_v19, %v396_v23, %v1334_v27  ;;  %v457_v1 = vshrl.u32 %v456_v21, 23  ;;  %v404_v45 = vmul.u32 %v1272_v19, %v388_v49 }
  0x5f   :  { %v967_v35 = vpop.eup %966  ;;  %v137_v6 = vxor.u32 2147483648, %v965_v22  ;;  %vm903_vm3 = vcmp.lt.s32.totalorder %v902_v17, 0  ;;  %v453_v47 = vand.u32 2147483647, %v1158_v12  ;;  %v334_v51 = vsel %vm1314_vm0, 0, %v332_v28 }
  0x60   :  { %v134_v39 = vxor.u32 2147483648, %v967_v35  ;;  %v316_v43 = vsel %vm903_vm3, 0, %v902_v17  ;;  %vm406_vm4 = vc.u32 %v1335_v30, %v1307_v46  ;;  %v908_v24 = vadd.s32 4294967169, %v457_v1 }
  0x61   :  { %v138_v41 = vsel %vm136_vm2, %v137_v6, %v967_v35  ;;  %v317_v37 = vsub.s32 32, %v316_v43  ;;  %v318_v48 = vshll.u32 %v1275_v54, %v316_v43  ;;  %v321_v29 = vsub.s32 4294967266, %v316_v43 }
  0x62   :  { %v135_v50 = vsel %vm133_vm1, %v965_v22, %v134_v39  ;;  %v408_v57 = vsel %vm406_vm4, %v407_v32, %v1308_v63  ;;  %v1352_v54 = vmul.f32 30.0, %v26_v31  ;;  %v463_v60 = vadd.s32 1, %v908_v24 }
  0x63   :  { %v139_v19 = vsel %vm132_vm15, %v135_v50, %v138_v41  ;;  %v319_v20 = vshrl.u32 %v301_v26, %v317_v37  ;;  %v322_v56 = vadd.s32 127, %v321_v29  ;;  %v409_v55 = vadd.s32 %v408_v57, %v404_v45 }
  0x64   :  { %v140_v58 = vsel %vm129_vm14, nan, %v139_v19  ;;  %v1356_v61 = vmul.f32 30.0, %v27_v18  ;;  %v338_v62 = vadd.s32 3, %v334_v51  ;;  %vm233_vm5 = vweird.f32 %v1063_v4 }
  0x65   :  { %v320_v0 = vor.u32 %v319_v20, %v318_v48  ;;  %v323_v7 = vshll.u32 %v322_v56, 23  ;;  %869 = vst [vmem:[#allocation5] sm:$0xff] %v140_v58  ;;  %vm240_vm6 = vcmp.eq.s32.totalorder %v1320_v14, 2  ;;  %v410_v53 = vadd.s32 536870912, %v409_v55 }
  0x66   :  { %vm464_vm7 = vcmp.gt.s32.totalorder %v463_v60, 0  ;;  %v969_v16 = vpop.eup %968  ;;  %v460_v3 = vand.u32 8388607, %v453_v47  ;;  %vm237_vm8 = vcmp.eq.s32.totalorder %v1320_v14, 0  ;;  %vm236_vm9 = vcmp.lt.s32.totalorder %v1320_v14, 2 }
  0x67   :  { %v324_v2 = vor.u32 4788187, %v323_v7  ;;  %v327_v9 = vcvt.s32.f32 %v320_v0  ;;  %v465_v10 = vsel %vm464_vm7, %v463_v60, 0  ;;  %v971_v8 = vpop.eup %970  ;;  %v241_v11 = vxor.u32 2147483648, %v969_v16 }
  0x68   :  { %v1363_v34 = vshrl.u32 %v410_v53, 30  ;;  %v467_v63 = vand.u32 31, %v465_v10  ;;  %v238_v13 = vxor.u32 2147483648, %v971_v8  ;;  %v1366_v17 = vand.u32 3, %v338_v62 }
  0x69   :  { %v325_v15 = vand.u32 2147483647, %v324_v2  ;;  %v242_v49 = vsel %vm240_vm6, %v241_v11, %v971_v8  ;;  %v560_v22 = vand.u32 2139095040, %v1352_v54  ;;  %v461_v27 = vor.u32 8388608, %v460_v3 }
  0x6a   :  { %v412_v23 = vshll.u32 %v1363_v34, 30  ;;  %v468_v21 = vsub.s32 32, %v467_v63  ;;  %v239_v26 = vsel %vm237_vm8, %v969_v16, %v238_v13  ;;  %v557_v35 = vand.u32 2147483647, %v1352_v54 }
  0x6b   :  { %v328_v28 = vmul.f32 %v327_v9, %v325_v15  ;;  %v243_v6 = vsel %vm236_vm9, %v239_v26, %v242_v49  ;;  %v405_v32 = vadd.s32 %v1307_v46, %v1335_v30  ;;  %v470_v39 = vshll.u32 %v1041_v36, %v467_v63 }
  0x6c   :  { %v1375_v1 = vsub.s32 %v409_v55, %v412_v23  ;;  %v244_v14 = vsel %vm233_vm5, nan, %v243_v6  ;;  %v471_v45 = vshrl.u32 %v1042_v38, %v468_v21  ;;  %v473_v31 = vshll.u32 %v1042_v38, %v467_v63 }
  0x6d   :  { %v329_v43 = vxor.u32 2147483648, %v328_v28  ;;  %v466_v37 = vshrl.u32 %v465_v10, 5  ;;  %v474_v48 = vshrl.u32 %v1043_v40, %v468_v21  ;;  %v561_v29 = vshrl.u32 %v560_v22, 23  ;;  %870 = vst [vmem:[#allocation5 + $0x8] sm:$0xff] %v244_v14 }
  0x6e   :  { %v415_v41 = vsub.s32 0, %v1375_v1  ;;  %v476_v30 = vshll.u32 %v1043_v40, %v467_v63  ;;  %v477_v4 = vshrl.u32 %v1044_v42, %v468_v21  ;;  %v479_v18 = vshll.u32 %v1044_v42, %v467_v63 }
  0x6f   :  { %v330_v46 = vsel %vm247_vm10, %v329_v43, %v328_v28  ;;  %v472_v24 = vor.u32 %v471_v45, %v470_v39  ;;  %v1393_v19 = vshll.u32 %v461_v27, 8  ;;  %v475_v20 = vor.u32 %v474_v48, %v473_v31 }
  0x70   :  { %v333_v50 = vsel %vm1314_vm0, %v1065_v5, %v330_v46  ;;  %v905_v51 = vmin.u32 %v415_v41, %v1375_v1  ;;  %v480_v56 = vshrl.u32 %v1045_v44, %v468_v21  ;;  %v482_v57 = vshll.u32 %v1045_v44, %v467_v63 }
  0x71   :  { %972 = vcosq.f32 %v333_v50  ;;  %vm351_vm10 = vcmp.lt.s32.totalorder %v1077_v25, 0  ;;  %v469_v55 = vshrl.u32 %v1041_v36, %v468_v21  ;;  %v912_v60 = vadd.s32 4294967169, %v561_v29 }
  0x72   :  { %974 = vsinq.f32 %v333_v50  ;;  %v417_v58 = vclz %v905_v51  ;;  %v478_v59 = vor.u32 %v477_v4, %v476_v30  ;;  %v481_v0 = vor.u32 %v480_v56, %v479_v18 }
  0x73   :  { %v483_v7 = vshrl.u32 %v1046_v52, %v468_v21  ;;  %vm485_vm11 = vcmp.lt.s32.totalorder %v466_v37, 1  ;;  %v435_v53 = vsub.s32 4, %v1363_v34  ;;  %vm487_vm12 = vcmp.lt.s32.totalorder %v466_v37, 3 }
  0x74   :  { %v906_v62 = vadd.s32 4294967294, %v417_v58  ;;  %vm488_vm13 = vcmp.lt.s32.totalorder %v466_v37, 4  ;;  %vm1403_vm14 = vcmp.le.f32.partialorder %v349_v33, 0.7853982  ;;  %vm486_vm15 = vcmp.lt.s32.totalorder %v466_v37, 2 }
  0x75   :  { %v484_v2 = vor.u32 %v483_v7, %v482_v57  ;;  %v490_v9 = vsel %vm488_vm13, %v478_v59, 2102212464  ;;  %v493_v3 = vsel %vm485_vm11, %v472_v24, %v475_v20  ;;  %v489_v10 = vsel %vm485_vm11, %v469_v55, %v472_v24 }
  0x76   :  { %vm907_vm0 = vcmp.lt.s32.totalorder %v906_v62, 0  ;;  %v491_v8 = vsel %vm487_vm12, %v475_v20, %v490_v9  ;;  %v494_v11 = vsel %vm488_vm13, %v481_v0, 920167782  ;;  %v497_v15 = vsel %vm485_vm11, %v475_v20, %v478_v59 }
  0x77   :  { %v420_v63 = vsel %vm907_vm0, 0, %v906_v62  ;;  %v495_v13 = vsel %vm487_vm12, %v478_v59, %v494_v11  ;;  %v498_v33 = vsel %vm488_vm13, %v484_v2, 1326507024  ;;  %vm337_vm1 = vweird.f32 %v1065_v5 }
  0x78   :  { %v421_v49 = vsub.s32 32, %v420_v63  ;;  %v422_v23 = vshll.u32 %v1375_v1, %v420_v63  ;;  %v425_v21 = vsub.s32 4294967266, %v420_v63  ;;  %v496_v22 = vsel %vm486_vm15, %v493_v3, %v495_v13 }
  0x79   :  { %v492_v26 = vsel %vm486_vm15, %v489_v10, %v491_v8  ;;  %v499_v28 = vsel %vm487_vm12, %v481_v0, %v498_v33  ;;  %v1418_v27 = vmul.u32.u64.low %v1393_v19, %v496_v22  ;;  %v1419_v6 = vmul.u32.u64.high %v1393_v19, %v496_v22, %v1418_v27 }
  0x7a   :  { %v423_v39 = vshrl.u32 %v405_v32, %v421_v49  ;;  %v426_v14 = vadd.s32 127, %v425_v21  ;;  %v500_v43 = vsel %vm486_vm15, %v497_v15, %v499_v28  ;;  %v567_v45 = vadd.s32 1, %v912_v60 }
  0x7b   :  { %v436_v1 = vsel %vm351_vm10, %v435_v53, %v1363_v34  ;;  %v1427_v31 = vmul.u32.u64.low %v1393_v19, %v500_v43  ;;  %v1428_v41 = vmul.u32.u64.high %v1393_v19, %v500_v43, %v1427_v31  ;;  %v1432_v48 = vand.u32 8388607, %v557_v35 }
  0x7c   :  { %vm340_vm2 = vcmp.lt.s32.totalorder %v1366_v17, 2  ;;  %v424_v29 = vor.u32 %v423_v39, %v422_v23  ;;  %v427_v32 = vshll.u32 %v426_v14, 23  ;;  %vm568_vm3 = vcmp.gt.s32.totalorder %v567_v45, 0 }
  0x7d   :  { %vm344_vm4 = vcmp.eq.s32.totalorder %v1366_v17, 2  ;;  %v508_v37 = vmul.u32 %v1393_v19, %v492_v26  ;;  %v511_v46 = vadd.s32 1, %v1419_v6  ;;  %v569_v34 = vsel %vm568_vm3, %v567_v45, 0 }
  0x7e   :  { %v973_v30 = vpop.eup %972  ;;  %v428_v4 = vor.u32 4788187, %v427_v32  ;;  %v431_v18 = vcvt.s32.f32 %v424_v29  ;;  %v438_v50 = vsel %vm1403_vm14, 0, %v436_v1  ;;  %v571_v51 = vand.u32 31, %v569_v34 }
  0x7f   :  { %v975_v24 = vpop.eup %974  ;;  %vm341_vm5 = vcmp.eq.s32.totalorder %v1366_v17, 0  ;;  %v345_v20 = vxor.u32 2147483648, %v973_v30  ;;  %vm510_vm6 = vc.u32 %v1428_v41, %v1418_v27  ;;  %v565_v56 = vor.u32 8388608, %v1432_v48 }
  0x80   :  { %v342_v19 = vxor.u32 2147483648, %v975_v24  ;;  %v429_v57 = vand.u32 2147483647, %v428_v4  ;;  %v512_v58 = vsel %vm510_vm6, %v511_v46, %v1419_v6  ;;  %v572_v55 = vsub.s32 32, %v571_v51 }
  0x81   :  { %v346_v60 = vsel %vm344_vm4, %v345_v20, %v975_v24  ;;  %v442_v59 = vadd.s32 3, %v438_v50  ;;  %v513_v0 = vadd.s32 %v512_v58, %v508_v37  ;;  %v574_v7 = vshll.u32 %v1041_v36, %v571_v51  ;;  %v28_v50 = vld [vmem:[#allocation2 + $0x38] sm:$0xff] }
  0x82   :  { %v343_v62 = vsel %vm341_vm5, %v973_v30, %v342_v19  ;;  %v432_v53 = vmul.f32 %v431_v18, %v429_v57  ;;  %v575_v2 = vshrl.u32 %v1042_v38, %v572_v55  ;;  %v577_v9 = vshll.u32 %v1042_v38, %v571_v51 }
  0x83   :  { %v347_v3 = vsel %vm340_vm2, %v343_v62, %v346_v60  ;;  %v514_v10 = vadd.s32 536870912, %v513_v0  ;;  %v570_v8 = vshrl.u32 %v569_v34, 5  ;;  %v578_v11 = vshrl.u32 %v1043_v40, %v572_v55 }
  0x84   :  { %v348_v63 = vsel %vm337_vm1, nan, %v347_v3  ;;  %v433_v13 = vxor.u32 2147483648, %v432_v53  ;;  %v580_v15 = vshll.u32 %v1043_v40, %v571_v51  ;;  %v581_v33 = vshrl.u32 %v1044_v42, %v572_v55 }
  0x85   :  { %v1457_v49 = vshrl.u32 %v514_v10, 30  ;;  %v576_v23 = vor.u32 %v575_v2, %v574_v7  ;;  %v583_v21 = vshll.u32 %v1044_v42, %v571_v51  ;;  %v584_v17 = vshrl.u32 %v1045_v44, %v572_v55  ;;  %871 = vst [vmem:[#allocation5 + $0x10] sm:$0xff] %v348_v63 }
  0x86   :  { %v434_v22 = vsel %vm351_vm10, %v433_v13, %v432_v53  ;;  %v579_v26 = vor.u32 %v578_v11, %v577_v9  ;;  %v586_v5 = vshll.u32 %v1045_v44, %v571_v51  ;;  %v587_v28 = vshrl.u32 %v1046_v52, %v572_v55 }
  0x87   :  { %v437_v6 = vsel %vm1403_vm14, %v1077_v25, %v434_v22  ;;  %v516_v39 = vshll.u32 %v1457_v49, 30  ;;  %v585_v14 = vor.u32 %v584_v17, %v583_v21  ;;  %v664_v43 = vand.u32 2139095040, %v1356_v61 }
  0x88   :  { %976 = vcosq.f32 %v437_v6  ;;  %v582_v45 = vor.u32 %v581_v33, %v580_v15  ;;  %v588_v1 = vor.u32 %v587_v28, %v586_v5  ;;  %vm589_vm7 = vcmp.lt.s32.totalorder %v570_v8, 1 }
  0x89   :  { %978 = vsinq.f32 %v437_v6  ;;  %v1470_v31 = vsub.s32 %v513_v0, %v516_v39  ;;  %v573_v48 = vshrl.u32 %v1041_v36, %v572_v55  ;;  %vm591_vm8 = vcmp.lt.s32.totalorder %v570_v8, 3 }
  0x8a   :  { %vm590_vm9 = vcmp.lt.s32.totalorder %v570_v8, 2  ;;  %vm592_vm10 = vcmp.lt.s32.totalorder %v570_v8, 4  ;;  %v597_v16 = vsel %vm589_vm7, %v576_v23, %v579_v26  ;;  %v605_v29 = vshll.u32 %v565_v56, 8 }
  0x8b   :  { %v519_v32 = vsub.s32 0, %v1470_v31  ;;  %v594_v37 = vsel %vm592_vm10, %v582_v45, 2102212464  ;;  %v598_v46 = vsel %vm592_vm10, %v585_v14, 920167782  ;;  %v443_v34 = vand.u32 3, %v442_v59 }
  0x8c   :  { %v599_v30 = vsel %vm591_vm8, %v582_v45, %v598_v46  ;;  %v602_v4 = vsel %vm592_vm10, %v588_v1, 1326507024  ;;  %v665_v18 = vshrl.u32 %v664_v43, 23  ;;  %v593_v24 = vsel %vm589_vm7, %v573_v48, %v576_v23 }
  0x8d   :  { %v909_v51 = vmin.u32 %v519_v32, %v1470_v31  ;;  %v600_v20 = vsel %vm590_vm9, %v597_v16, %v599_v30  ;;  %v601_v19 = vsel %vm589_vm7, %v579_v26, %v582_v45  ;;  %v595_v56 = vsel %vm591_vm8, %v579_v26, %v594_v37 }
  0x8e   :  { %v603_v57 = vsel %vm591_vm8, %v585_v14, %v602_v4  ;;  %v1482_v58 = vmul.u32.u64.low %v605_v29, %v600_v20  ;;  %v1483_v55 = vmul.u32.u64.high %v605_v29, %v600_v20, %v1482_v58  ;;  %v1486_v59 = vmul.f32 30.0, %v28_v50 }
  0x8f   :  { %v521_v60 = vclz %v909_v51  ;;  %v539_v0 = vsub.s32 4, %v1457_v49  ;;  %v604_v7 = vsel %vm590_vm9, %v601_v19, %v603_v57  ;;  %v916_v62 = vadd.s32 4294967169, %v665_v18 }
  0x90   :  { %v596_v2 = vsel %vm590_vm9, %v593_v24, %v595_v56  ;;  %v1491_v9 = vmul.u32.u64.low %v605_v29, %v604_v7  ;;  %v1492_v3 = vmul.u32.u64.high %v605_v29, %v604_v7, %v1491_v9  ;;  %vm444_vm11 = vcmp.lt.s32.totalorder %v443_v34, 2 }
  0x91   :  { %v910_v53 = vadd.s32 4294967294, %v521_v60  ;;  %vm455_vm12 = vcmp.lt.s32.totalorder %v1158_v12, 0  ;;  %v661_v10 = vand.u32 2147483647, %v1356_v61  ;;  %v671_v11 = vadd.s32 1, %v916_v62 }
  0x92   :  { %vm445_vm13 = vcmp.eq.s32.totalorder %v443_v34, 0  ;;  %v509_v63 = vadd.s32 %v1418_v27, %v1428_v41  ;;  %v615_v13 = vadd.s32 1, %v1483_v55  ;;  %vm448_vm15 = vcmp.eq.s32.totalorder %v443_v34, 2 }
  0x93   :  { %vm911_vm14 = vcmp.lt.s32.totalorder %v910_v53, 0  ;;  %v612_v8 = vmul.u32 %v605_v29, %v596_v2  ;;  %vm672_vm0 = vcmp.gt.s32.totalorder %v671_v11, 0  ;;  %v1503_v22 = vsel %vm455_vm12, %v539_v0, %v1457_v49 }
  0x94   :  { %v524_v15 = vsel %vm911_vm14, 0, %v910_v53  ;;  %vm614_vm1 = vc.u32 %v1492_v3, %v1482_v58  ;;  %v668_v27 = vand.u32 8388607, %v661_v10  ;;  %v673_v41 = vsel %vm672_vm0, %v671_v11, 0 }
  0x95   :  { %v977_v33 = vpop.eup %976  ;;  %v525_v23 = vsub.s32 32, %v524_v15  ;;  %v526_v21 = vshll.u32 %v1470_v31, %v524_v15  ;;  %v529_v17 = vsub.s32 4294967266, %v524_v15  ;;  %v616_v14 = vsel %vm614_vm1, %v615_v13, %v1483_v55 }
  0x96   :  { %v979_v26 = vpop.eup %978  ;;  %v449_v5 = vxor.u32 2147483648, %v977_v33  ;;  %vm441_vm2 = vweird.f32 %v1077_v25  ;;  %v617_v49 = vadd.s32 %v616_v14, %v612_v8  ;;  %v675_v45 = vand.u32 31, %v673_v41 }
  0x97   :  { %v446_v28 = vxor.u32 2147483648, %v979_v26  ;;  %v527_v6 = vshrl.u32 %v509_v63, %v525_v23  ;;  %v530_v39 = vadd.s32 127, %v529_v17  ;;  %vm1515_vm3 = vcmp.le.f32.partialorder %v453_v47, 0.7853982 }
  0x98   :  { %v450_v43 = vsel %vm448_vm15, %v449_v5, %v979_v26  ;;  %v542_v25 = vsel %vm1515_vm3, 0, %v1503_v22  ;;  %v618_v32 = vadd.s32 536870912, %v617_v49  ;;  %v676_v37 = vsub.s32 32, %v675_v45 }
  0x99   :  { %v447_v1 = vsel %vm445_vm13, %v977_v33, %v446_v28  ;;  %v528_v48 = vor.u32 %v527_v6, %v526_v21  ;;  %v531_v16 = vshll.u32 %v530_v39, 23  ;;  %v669_v18 = vor.u32 8388608, %v668_v27 }
  0x9a   :  { %v451_v29 = vsel %vm444_vm11, %v447_v1, %v450_v43  ;;  %v1523_v50 = vshrl.u32 %v618_v32, 30  ;;  %v678_v47 = vshll.u32 %v1041_v36, %v675_v45  ;;  %v681_v51 = vshll.u32 %v1042_v38, %v675_v45 }
  0x9b   :  { %v452_v46 = vsel %vm441_vm2, nan, %v451_v29  ;;  %v532_v30 = vor.u32 4788187, %v531_v16  ;;  %v535_v4 = vcvt.s32.f32 %v528_v48  ;;  %v768_v24 = vand.u32 2139095040, %v1486_v59 }
  0x9c   :  { %872 = vst [vmem:[#allocation5 + $0x18] sm:$0xff] %v452_v46  ;;  %v679_v20 = vshrl.u32 %v1042_v38, %v676_v37  ;;  %v682_v19 = vshrl.u32 %v1043_v40, %v676_v37  ;;  %v687_v56 = vshll.u32 %v1044_v42, %v675_v45  ;;  %v620_v57 = vshll.u32 %v1523_v50, 30 }
  0x9d   :  { %v533_v34 = vand.u32 2147483647, %v532_v30  ;;  %v674_v55 = vshrl.u32 %v673_v41, 5  ;;  %v684_v60 = vshll.u32 %v1043_v40, %v675_v45  ;;  %v685_v0 = vshrl.u32 %v1044_v42, %v676_v37 }
  0x9e   :  { %v688_v62 = vshrl.u32 %v1045_v44, %v676_v37  ;;  %v690_v53 = vshll.u32 %v1045_v44, %v675_v45  ;;  %v1536_v2 = vshll.u32 %v669_v18, 8  ;;  %v1538_v9 = vsub.s32 %v617_v49, %v620_v57 }
  0x9f   :  { %v536_v7 = vmul.f32 %v535_v4, %v533_v34  ;;  %v677_v11 = vshrl.u32 %v1041_v36, %v676_v37  ;;  %v691_v63 = vshrl.u32 %v1046_v52, %v676_v37  ;;  %v769_v13 = vshrl.u32 %v768_v24, 23 }
  0xa0   :  { %v680_v8 = vor.u32 %v679_v20, %v678_v47  ;;  %v683_v33 = vor.u32 %v682_v19, %v681_v51  ;;  %v689_v23 = vor.u32 %v688_v62, %v687_v56  ;;  %v623_v21 = vsub.s32 0, %v1538_v9 }
  0xa1   :  { %v537_v15 = vxor.u32 2147483648, %v536_v7  ;;  %v686_v17 = vor.u32 %v685_v0, %v684_v60  ;;  %vm693_vm4 = vcmp.lt.s32.totalorder %v674_v55, 1  ;;  %vm694_vm5 = vcmp.lt.s32.totalorder %v674_v55, 2 }
  0xa2   :  { %v692_v26 = vor.u32 %v691_v63, %v690_v53  ;;  %vm695_vm6 = vcmp.lt.s32.totalorder %v674_v55, 3  ;;  %vm696_vm7 = vcmp.lt.s32.totalorder %v674_v55, 4  ;;  %v913_v27 = vmin.u32 %v623_v21, %v1538_v9 }
  0xa3   :  { %v538_v22 = vsel %vm455_vm12, %v537_v15, %v536_v7  ;;  %v697_v41 = vsel %vm693_vm4, %v677_v11, %v680_v8  ;;  %v698_v28 = vsel %vm696_vm7, %v686_v17, 2102212464  ;;  %v701_v39 = vsel %vm693_vm4, %v680_v8, %v683_v33 }
  0xa4   :  { %v541_v5 = vsel %vm1515_vm3, %v1158_v12, %v538_v22  ;;  %v699_v6 = vsel %vm695_vm6, %v683_v33, %v698_v28  ;;  %v702_v14 = vsel %vm696_vm7, %v689_v23, 920167782  ;;  %v625_v43 = vclz %v913_v27 }
  0xa5   :  { %980 = vcosq.f32 %v541_v5  ;;  %v705_v49 = vsel %vm693_vm4, %v683_v33, %v686_v17  ;;  %v920_v45 = vadd.s32 4294967169, %v769_v13  ;;  %v546_v1 = vadd.s32 3, %v542_v25 }
  0xa6   :  { %982 = vsinq.f32 %v541_v5  ;;  %v703_v31 = vsel %vm695_vm6, %v686_v17, %v702_v14  ;;  %v706_v48 = vsel %vm696_vm7, %v692_v26, 1326507024  ;;  %v914_v16 = vadd.s32 4294967294, %v625_v43 }
  0xa7   :  { %v700_v29 = vsel %vm694_vm5, %v697_v41, %v699_v6  ;;  %v704_v32 = vsel %vm694_vm5, %v701_v39, %v703_v31  ;;  %v707_v37 = vsel %vm695_vm6, %v689_v23, %v706_v48  ;;  %v613_v46 = vadd.s32 %v1482_v58, %v1492_v3 }
  0xa8   :  { %v708_v30 = vsel %vm694_vm5, %v705_v49, %v707_v37  ;;  %v1561_v4 = vmul.u32.u64.low %v1536_v2, %v704_v32  ;;  %v1562_v18 = vmul.u32.u64.high %v1536_v2, %v704_v32, %v1561_v4  ;;  %vm915_vm8 = vcmp.lt.s32.totalorder %v914_v16, 0 }
  0xa9   :  { %v1566_v25 = vmul.u32.u64.low %v1536_v2, %v708_v30  ;;  %v1567_v47 = vmul.u32.u64.high %v1536_v2, %v708_v30, %v1566_v25  ;;  %v775_v51 = vadd.s32 1, %v920_v45  ;;  %v547_v24 = vand.u32 3, %v546_v1 }
  0xaa   :  { %v628_v34 = vsel %vm915_vm8, 0, %v914_v16  ;;  %v716_v20 = vmul.u32 %v1536_v2, %v700_v29  ;;  %vm545_vm10 = vweird.f32 %v1158_v12  ;;  %v643_v56 = vsub.s32 4, %v1523_v50 }
  0xab   :  { %v629_v19 = vsub.s32 32, %v628_v34  ;;  %v630_v58 = vshll.u32 %v1538_v9, %v628_v34  ;;  %v633_v3 = vsub.s32 4294967266, %v628_v34  ;;  %vm776_vm9 = vcmp.gt.s32.totalorder %v775_v51, 0 }
  0xac   :  { %v719_v57 = vadd.s32 1, %v1562_v18  ;;  %v765_v55 = vand.u32 2147483647, %v1486_v59  ;;  %v777_v60 = vsel %vm776_vm9, %v775_v51, 0  ;;  %vm559_vm11 = vcmp.lt.s32.totalorder %v1352_v54, 0 }
  0xad   :  { %v631_v0 = vshrl.u32 %v613_v46, %v629_v19  ;;  %v634_v7 = vadd.s32 127, %v633_v3  ;;  %vm718_vm12 = vc.u32 %v1567_v47, %v1561_v4  ;;  %vm548_vm13 = vcmp.lt.s32.totalorder %v547_v24, 2 }
  0xae   :  { %vm1580_vm14 = vcmp.le.f32.partialorder %v557_v35, 0.7853982  ;;  %v720_v53 = vsel %vm718_vm12, %v719_v57, %v1562_v18  ;;  %v779_v2 = vand.u32 31, %v777_v60  ;;  %vm549_vm15 = vcmp.eq.s32.totalorder %v547_v24, 0 }
  0xaf   :  { %v632_v9 = vor.u32 %v631_v0, %v630_v58  ;;  %v635_v11 = vshll.u32 %v634_v7, 23  ;;  %v721_v63 = vadd.s32 %v720_v53, %v716_v20  ;;  %vm552_vm0 = vcmp.eq.s32.totalorder %v547_v24, 2 }
  0xb0   :  { %v644_v13 = vsel %vm559_vm11, %v643_v56, %v1523_v50  ;;  %v772_v15 = vand.u32 8388607, %v765_v55  ;;  %v780_v8 = vsub.s32 32, %v779_v2  ;;  %v778_v17 = vshrl.u32 %v777_v60, 5 }
  0xb1   :  { %v636_v33 = vor.u32 4788187, %v635_v11  ;;  %v639_v23 = vcvt.s32.f32 %v632_v9  ;;  %v722_v21 = vadd.s32 536870912, %v721_v63  ;;  %v782_v5 = vshll.u32 %v1041_v36, %v779_v2 }
  0xb2   :  { %v981_v35 = vpop.eup %980  ;;  %v785_v27 = vshll.u32 %v1042_v38, %v779_v2  ;;  %v788_v41 = vshll.u32 %v1043_v40, %v779_v2  ;;  %v791_v39 = vshll.u32 %v1044_v42, %v779_v2  ;;  %v783_v43 = vshrl.u32 %v1042_v38, %v780_v8 }
  0xb3   :  { %v983_v22 = vpop.eup %982  ;;  %v553_v26 = vxor.u32 2147483648, %v981_v35  ;;  %v637_v6 = vand.u32 2147483647, %v636_v33  ;;  %v1593_v50 = vshrl.u32 %v722_v21, 30  ;;  %v786_v49 = vshrl.u32 %v1043_v40, %v780_v8 }
  0xb4   :  { %v550_v28 = vxor.u32 2147483648, %v983_v22  ;;  %v792_v45 = vshrl.u32 %v1045_v44, %v780_v8  ;;  %v789_v16 = vshrl.u32 %v1044_v42, %v780_v8  ;;  %v646_v32 = vsel %vm1580_vm14, 0, %v644_v13 }
  0xb5   :  { %v554_v14 = vsel %vm552_vm0, %v553_v26, %v983_v22  ;;  %v640_v31 = vmul.f32 %v639_v23, %v637_v6  ;;  %v724_v48 = vshll.u32 %v1593_v50, 30  ;;  %v773_v37 = vor.u32 8388608, %v772_v15 }
  0xb6   :  { %v551_v1 = vsel %vm549_vm15, %v981_v35, %v550_v28  ;;  %v794_v46 = vshll.u32 %v1045_v44, %v779_v2  ;;  %v781_v18 = vshrl.u32 %v1041_v36, %v780_v8  ;;  %v784_v25 = vor.u32 %v783_v43, %v782_v5 }
  0xb7   :  { %v555_v29 = vsel %vm548_vm13, %v551_v1, %v554_v14  ;;  %v641_v40 = vxor.u32 2147483648, %v640_v31  ;;  %v725_v30 = vsub.s32 %v721_v63, %v724_v48  ;;  %v787_v51 = vor.u32 %v786_v49, %v785_v27 }
  0xb8   :  { %v556_v38 = vsel %vm545_vm10, nan, %v555_v29  ;;  %v793_v34 = vor.u32 %v792_v45, %v791_v39  ;;  %v795_v42 = vshrl.u32 %v1046_v52, %v780_v8  ;;  %v790_v19 = vor.u32 %v789_v16, %v788_v41 }
  0xb9   :  { %873 = vst [vmem:[#allocation5 + $0x20] sm:$0xff] %v556_v38  ;;  %v642_v24 = vsel %vm559_vm11, %v641_v40, %v640_v31  ;;  %v727_v20 = vsub.s32 0, %v725_v30  ;;  %vm797_vm1 = vcmp.lt.s32.totalorder %v778_v17, 1  ;;  %vm800_vm2 = vcmp.lt.s32.totalorder %v778_v17, 4 }
  0xba   :  { %v645_v44 = vsel %vm1580_vm14, %v1352_v54, %v642_v24  ;;  %v796_v12 = vor.u32 %v795_v42, %v794_v46  ;;  %v813_v58 = vshll.u32 %v773_v37, 8  ;;  %vm799_vm3 = vcmp.lt.s32.totalorder %v778_v17, 3 }
  0xbb   :  { %984 = vcosq.f32 %v645_v44  ;;  %v917_v36 = vmin.u32 %v727_v20, %v725_v30  ;;  %v802_v3 = vsel %vm800_vm2, %v790_v19, 2102212464  ;;  %vm798_vm4 = vcmp.lt.s32.totalorder %v778_v17, 2 }
  0xbc   :  { %986 = vsinq.f32 %v645_v44  ;;  %v805_v52 = vsel %vm797_vm1, %v784_v25, %v787_v51  ;;  %v806_v56 = vsel %vm800_vm2, %v793_v34, 920167782  ;;  %v801_v60 = vsel %vm797_vm1, %v781_v18, %v784_v25 }
  0xbd   :  { %v729_v57 = vclz %v917_v36  ;;  %v803_v0 = vsel %vm799_vm3, %v787_v51, %v802_v3  ;;  %v807_v7 = vsel %vm799_vm3, %v790_v19, %v806_v56  ;;  %v809_v62 = vsel %vm797_vm1, %v787_v51, %v790_v19 }
  0xbe   :  { %v810_v53 = vsel %vm800_vm2, %v796_v12, 1326507024  ;;  %v650_v2 = vadd.s32 3, %v646_v32  ;;  %v808_v11 = vsel %vm798_vm4, %v805_v52, %v807_v7  ;;  %v804_v13 = vsel %vm798_vm4, %v801_v60, %v803_v0 }
  0xbf   :  { %v918_v9 = vadd.s32 4294967294, %v729_v57  ;;  %v811_v63 = vsel %vm799_vm3, %v793_v34, %v810_v53  ;;  %v1619_v8 = vmul.u32.u64.low %v813_v58, %v808_v11  ;;  %v1620_v35 = vmul.u32.u64.high %v813_v58, %v808_v11, %v1619_v8 }
  0xc0   :  { %v812_v15 = vsel %vm798_vm4, %v809_v62, %v811_v63  ;;  %v717_v33 = vadd.s32 %v1561_v4, %v1567_v47  ;;  %v820_v27 = vmul.u32 %v813_v58, %v804_v13  ;;  %v651_v41 = vand.u32 3, %v650_v2 }
  0xc1   :  { %vm919_vm5 = vcmp.lt.s32.totalorder %v918_v9, 0  ;;  %v1624_v23 = vmul.u32.u64.low %v813_v58, %v812_v15  ;;  %v1625_v21 = vmul.u32.u64.high %v813_v58, %v812_v15, %v1624_v23  ;;  %v823_v28 = vadd.s32 1, %v1620_v35 }
  0xc2   :  { %v732_v22 = vsel %vm919_vm5, 0, %v918_v9  ;;  %vm653_vm7 = vcmp.eq.s32.totalorder %v651_v41, 0  ;;  %vm656_vm8 = vcmp.eq.s32.totalorder %v651_v41, 2  ;;  %vm652_vm9 = vcmp.lt.s32.totalorder %v651_v41, 2 }
  0xc3   :  { %v733_v17 = vsub.s32 32, %v732_v22  ;;  %v734_v26 = vshll.u32 %v725_v30, %v732_v22  ;;  %v737_v5 = vsub.s32 4294967266, %v732_v22  ;;  %vm822_vm6 = vc.u32 %v1625_v21, %v1619_v8 }
  0xc4   :  { %v824_v14 = vsel %vm822_vm6, %v823_v28, %v1620_v35  ;;  %vm649_vm10 = vweird.f32 %v1352_v54  ;;  %vm663_vm11 = vcmp.lt.s32.totalorder %v1356_v61, 0  ;;  %v747_v51 = vsub.s32 4, %v1593_v50 }
  0xc5   :  { %v735_v6 = vshrl.u32 %v717_v33, %v733_v17  ;;  %v738_v39 = vadd.s32 127, %v737_v5  ;;  %v825_v47 = vadd.s32 %v824_v14, %v820_v27  ;;  %vm662_vm12 = vcmp.le.f32.partialorder %v661_v10, 0.7853982 }
  0xc6   :  { %v748_v20 = vsel %vm663_vm11, %v747_v51, %v1593_v50  ;;  %v821_v52 = vadd.s32 %v1619_v8, %v1625_v21  ;;  %vm753_vm1 = vweird.f32 %v1356_v61  ;;  %vm767_vm2 = vcmp.lt.s32.totalorder %v1486_v59, 0 }
  0xc7   :  { %v736_v43 = vor.u32 %v735_v6, %v734_v26  ;;  %v739_v4 = vshll.u32 %v738_v39, 23  ;;  %v826_v16 = vadd.s32 536870912, %v825_v47  ;;  %v750_v12 = vsel %vm662_vm12, 0, %v748_v20 }
  0xc8   :  { %v985_v49 = vpop.eup %984  ;;  %v754_v3 = vadd.s32 3, %v750_v12  ;;  %vm766_vm3 = vcmp.le.f32.partialorder %v765_v55, 0.7853982 }
  0xc9   :  { %v987_v45 = vpop.eup %986  ;;  %v657_v1 = vxor.u32 2147483648, %v985_v49  ;;  %v740_v31 = vor.u32 4788187, %v739_v4  ;;  %v743_v48 = vcvt.s32.f32 %v736_v43  ;;  %v827_v46 = vshrl.u32 %v826_v16, 30 }
  0xca   :  { %v654_v29 = vxor.u32 2147483648, %v987_v45  ;;  %v755_v0 = vand.u32 3, %v754_v3 }
  0xcb   :  { %v658_v32 = vsel %vm656_vm8, %v657_v1, %v987_v45  ;;  %v741_v37 = vand.u32 2147483647, %v740_v31  ;;  %v828_v18 = vshll.u32 %v827_v46, 30  ;;  %v851_v17 = vsub.s32 4, %v827_v46 }
  0xcc   :  { %v655_v38 = vsel %vm653_vm7, %v985_v49, %v654_v29  ;;  %vm760_vm14 = vcmp.eq.s32.totalorder %v755_v0, 2  ;;  %vm757_vm15 = vcmp.eq.s32.totalorder %v755_v0, 0  ;;  %vm756_vm0 = vcmp.lt.s32.totalorder %v755_v0, 2 }
  0xcd   :  { %v659_v40 = vsel %vm652_vm9, %v655_v38, %v658_v32  ;;  %v744_v30 = vmul.f32 %v743_v48, %v741_v37  ;;  %v829_v42 = vsub.s32 %v825_v47, %v828_v18  ;;  %v852_v27 = vsel %vm767_vm2, %v851_v17, %v827_v46 }
  0xce   :  { %v660_v25 = vsel %vm649_vm10, nan, %v659_v40  ;;  %vm857_vm7 = vweird.f32 %v1486_v59 }
  0xcf   :  { %v745_v34 = vxor.u32 2147483648, %v744_v30  ;;  %874 = vst [vmem:[#allocation5 + $0x28] sm:$0xff] %v660_v25  ;;  %v831_v54 = vsub.s32 0, %v829_v42 }
  0xd1   :  { %v746_v24 = vsel %vm663_vm11, %v745_v34, %v744_v30  ;;  %v921_v44 = vmin.u32 %v831_v54, %v829_v42 }
  0xd2   :  { %v749_v19 = vsel %vm662_vm12, %v1356_v61, %v746_v24  ;;  %v854_v61 = vsel %vm766_vm3, 0, %v852_v27 }
  0xd3   :  { %988 = vcosq.f32 %v749_v19  ;;  %v833_v58 = vclz %v921_v44  ;;  %v858_v28 = vadd.s32 3, %v854_v61 }
  0xd4   :  { %990 = vsinq.f32 %v749_v19 }
  0xd5   :  { %v922_v36 = vadd.s32 4294967294, %v833_v58  ;;  %v859_v6 = vand.u32 3, %v858_v28 }
  0xd7   :  { %vm923_vm13 = vcmp.lt.s32.totalorder %v922_v36, 0  ;;  %vm864_vm4 = vcmp.eq.s32.totalorder %v859_v6, 2  ;;  %vm861_vm5 = vcmp.eq.s32.totalorder %v859_v6, 0  ;;  %vm860_vm6 = vcmp.lt.s32.totalorder %v859_v6, 2 }
  0xd8   :  { %v836_v10 = vsel %vm923_vm13, 0, %v922_v36 }
  0xd9   :  { %v837_v56 = vsub.s32 32, %v836_v10  ;;  %v838_v57 = vshll.u32 %v829_v42, %v836_v10  ;;  %v841_v60 = vsub.s32 4294967266, %v836_v10 }
  0xdb   :  { %v839_v7 = vshrl.u32 %v821_v52, %v837_v56  ;;  %v842_v62 = vadd.s32 127, %v841_v60 }
  0xdd   :  { %v840_v50 = vor.u32 %v839_v7, %v838_v57  ;;  %v843_v53 = vshll.u32 %v842_v62, 23 }
  0xdf   :  { %v844_v63 = vor.u32 4788187, %v843_v53  ;;  %v847_v13 = vcvt.s32.f32 %v840_v50 }
  0xe0   :  { %v989_v2 = vpop.eup %988 }
  0xe1   :  { %v991_v9 = vpop.eup %990  ;;  %v761_v11 = vxor.u32 2147483648, %v989_v2  ;;  %v845_v35 = vand.u32 2147483647, %v844_v63 }
  0xe2   :  { %v758_v15 = vxor.u32 2147483648, %v991_v9 }
  0xe3   :  { %v762_v8 = vsel %vm760_vm14, %v761_v11, %v991_v9  ;;  %v848_v21 = vmul.f32 %v847_v13, %v845_v35 }
  0xe4   :  { %v759_v33 = vsel %vm757_vm15, %v989_v2, %v758_v15 }
  0xe5   :  { %v763_v23 = vsel %vm756_vm0, %v759_v33, %v762_v8  ;;  %v849_v26 = vxor.u32 2147483648, %v848_v21 }
  0xe6   :  { %v764_v22 = vsel %vm753_vm1, nan, %v763_v23 }
  0xe7   :  { %875 = vst [vmem:[#allocation5 + $0x30] sm:$0xff] %v764_v22  ;;  %v850_v5 = vsel %vm767_vm2, %v849_v26, %v848_v21 }
  0xe8   :  { %v853_v41 = vsel %vm766_vm3, %v1486_v59, %v850_v5 }
  0xe9   :  { %992 = vcosq.f32 %v853_v41 }
  0xea   :  { %994 = vsinq.f32 %v853_v41 }
  0xf6   :  { %v993_v39 = vpop.eup %992 }
  0xf7   :  { %v995_v14 = vpop.eup %994  ;;  %v865_v43 = vxor.u32 2147483648, %v993_v39 }
  0xf8   :  { %v862_v4 = vxor.u32 2147483648, %v995_v14 }
  0xf9   :  { %v866_v55 = vsel %vm864_vm4, %v865_v43, %v995_v14 }
  0xfa   :  { %v863_v47 = vsel %vm861_vm5, %v993_v39, %v862_v4 }
  0xfb   :  { %v867_v49 = vsel %vm860_vm6, %v863_v47, %v866_v55 }
  0xfc   :  { %v868_v45 = vsel %vm857_vm7, nan, %v867_v49 }
  0xfd   :  { %876 = vst [vmem:[#allocation5 + $0x38] sm:$0xff] %v868_v45 }
  0xfe   :  { %1027 = shalt.err (!%p1024_p9)
}
  0xff   :  { %886 = dma.vmem_to_hbm [thread:$0]  %s884_s11, 1024, %s1648_s1, [#allocation4]  }
 0x100   :  { %1038 = dma.done.wait [#allocation4], 1024  }
 0x101   :  { %1039 = vsyncadd [#allocation4], 4294966272 }
 0x102   :  { %890 = vsyncpa [#allocation3], 1 }
 0x103   :  { %891 = vsyncpa [#allocation4], 1 }

</bundles_post_ra>
